<compile_context>
chip_gen: v6e
topology: v6e:2x2x1
jax: 0.10.0
libtpu: 0.0.40
codegen_flags: <defaults>
</compile_context>

<pallas_src>
import jax
import jax.numpy as jnp
from jax.experimental import pallas as pl
from jax.experimental.pallas import tpu as pltpu

HIDDEN = 512      # fixed by the module definition
LANE = 128        # TPU lane width
SUBLANE = 8       # TPU sublane count
TB_TARGET = 256   # batch tile (MXU M-tile sized)


def _round_up(n, m):
    return ((n + m - 1) // m) * m


def _pad_to(a, shape):
    """Zero-pad `a` up to `shape` (no-op if already that shape)."""
    if a.shape == tuple(shape):
        return a
    pads = [(0, t - s) for s, t in zip(a.shape, shape)]
    return jnp.pad(a, pads)


def _cfr_kernel(x_ref, w1_ref, b1_ref, w2_ref, b2_ref, o_ref):
    # Linear(input_dim, 512) + ReLU.  Dropout(0.3) is identity in eval mode.
    h = jnp.dot(x_ref[...], w1_ref[...], preferred_element_type=jnp.float32)
    h = jnp.maximum(h + b1_ref[...], 0.0)            # (TB, 512) + (1, 512)
    # TODO(synk): training-mode Dropout(0.3) would need pltpu.prng_seed /
    # pltpu.prng_random_bits + 1/(1-p) scaling; inference forward implemented.
    # Linear(512, output_dim) + Sigmoid.
    logits = jnp.dot(h, w2_ref[...], preferred_element_type=jnp.float32)
    o_ref[...] = jax.nn.sigmoid(logits + b2_ref[...]).astype(o_ref.dtype)


@jax.jit
def cfr_classifier_forward(x, w1, b1, w2, b2):
    """x: (B, in). w1: (in, 512). b1: (1, 512). w2: (512, out). b2: (1, out)."""
    batch, input_dim = x.shape
    hidden, output_dim = w2.shape
    assert hidden == HIDDEN and w1.shape == (input_dim, HIDDEN)
    assert b1.shape == (1, HIDDEN) and b2.shape == (1, output_dim)

    # Lane-dense padding of the contraction / output feature axes.
    in_pad = _round_up(input_dim, LANE)
    out_pad = _round_up(output_dim, LANE)
    # Batch tile: TB_TARGET, or the whole (sublane-rounded) batch when smaller.
    tb = min(TB_TARGET, _round_up(batch, SUBLANE))
    b_pad = _round_up(batch, tb)

    xp = _pad_to(x, (b_pad, in_pad))
    w1p = _pad_to(w1, (in_pad, HIDDEN))
    w2p = _pad_to(w2, (HIDDEN, out_pad))
    b2p = _pad_to(b2, (1, out_pad))

    # VMEM budget: resident weights/biases + double-buffered x/out tiles,
    # 2x headroom, floored at 32 MiB, capped under v7x's 64 MiB physical VMEM.
    dsize = 4  # f32 bytes
    resident = (in_pad * HIDDEN + HIDDEN * out_pad + HIDDEN + out_pad) * dsize
    streamed = 2 * (tb * in_pad + tb * out_pad) * dsize
    vmem_limit = int(min(max((resident + streamed) * 2, 32 << 20), 56 << 20))

    out = pl.pallas_call(
        _cfr_kernel,
        out_shape=jax.ShapeDtypeStruct((b_pad, out_pad), jnp.float32),
        grid=(b_pad // tb,),
        in_specs=[
            pl.BlockSpec((tb, in_pad), lambda i: (i, 0)),       # x tile (streamed)
            pl.BlockSpec((in_pad, HIDDEN), lambda i: (0, 0)),   # W1 (resident)
            pl.BlockSpec((1, HIDDEN), lambda i: (0, 0)),        # b1 (resident)
            pl.BlockSpec((HIDDEN, out_pad), lambda i: (0, 0)),  # W2 (resident)
            pl.BlockSpec((1, out_pad), lambda i: (0, 0)),       # b2 (resident)
        ],
        out_specs=pl.BlockSpec((tb, out_pad), lambda i: (i, 0)),
        compiler_params=pltpu.CompilerParams(
            dimension_semantics=("parallel",),  # megacore sharding on v7x
            vmem_limit_bytes=vmem_limit,
        ),
    )(xp, w1p, b1, w2p, b2p)

    return out[:batch, :output_dim]


def init_params(key, input_dim, output_dim):
    """Deterministic synthetic params matching nn.Linear init bounds.

    PyTorch stores Linear weight as (out_features, in_features); we keep the
    transposed (in, out) layout so the kernel computes x @ W directly.
    """
    k1, k2, k3, k4 = jax.random.split(key, 4)
    bound1 = 1.0 / jnp.sqrt(input_dim)
    bound2 = 1.0 / jnp.sqrt(HIDDEN)
    w1 = jax.random.uniform(k1, (input_dim, HIDDEN), jnp.float32, -bound1, bound1)
    b1 = jax.random.uniform(k2, (1, HIDDEN), jnp.float32, -bound1, bound1)
    w2 = jax.random.uniform(k3, (HIDDEN, output_dim), jnp.float32, -bound2, bound2)
    b2 = jax.random.uniform(k4, (1, output_dim), jnp.float32, -bound2, bound2)
    return w1, b1, w2, b2


if __name__ == "__main__":
    batch, input_dim, output_dim = 2, 32, 8

    key = jax.random.PRNGKey(0)
    kx, kp = jax.random.split(key)
    x = jax.random.normal(kx, (batch, input_dim), jnp.float32)
    w1, b1, w2, b2 = init_params(kp, input_dim, output_dim)

    out = cfr_classifier_forward(x, w1, b1, w2, b2)
    out = jax.block_until_ready(out)

    # Sanity-check against a plain-JAX reference of the same forward pass.
    ref = jax.nn.sigmoid(jnp.maximum(x @ w1 + b1, 0.0) @ w2 + b2)
    assert out.shape == (batch, output_dim)
    assert jnp.allclose(out, ref, atol=1e-5), "mismatch vs reference"

    print("KERNEL_OK")
</pallas_src>

<mosaic_0001>
module attributes {stable_mosaic.version = 11 : i64} {
  func.func @_cfr_kernel(%arg0: i32, %arg1: memref<8x128xf32, #tpu.memory_space<vmem>>, %arg2: memref<128x512xf32, #tpu.memory_space<vmem>>, %arg3: memref<1x512xf32, #tpu.memory_space<vmem>>, %arg4: memref<512x128xf32, #tpu.memory_space<vmem>>, %arg5: memref<1x128xf32, #tpu.memory_space<vmem>>, %arg6: memref<8x128xf32, #tpu.memory_space<vmem>>) attributes {dimension_semantics = [#tpu.dimension_semantics<parallel>], iteration_bounds = array<i64: 1>, scalar_prefetch = 0 : i64, scratch_operands = 0 : i64, tpu.core_type = #tpu.core_type<tc>, window_params = [{transform_indices = @transform_0, window_bounds = array<i64: 8, 128>}, {pipeline_mode = #tpu.pipeline_mode<synchronous>, transform_indices = @transform_1, window_bounds = array<i64: 128, 512>}, {pipeline_mode = #tpu.pipeline_mode<synchronous>, transform_indices = @transform_2, window_bounds = array<i64: 1, 512>}, {pipeline_mode = #tpu.pipeline_mode<synchronous>, transform_indices = @transform_3, window_bounds = array<i64: 512, 128>}, {pipeline_mode = #tpu.pipeline_mode<synchronous>, transform_indices = @transform_4, window_bounds = array<i64: 1, 128>}, {transform_indices = @transform_5, window_bounds = array<i64: 8, 128>}]} {
    %c0 = arith.constant 0 : index
    %c0_0 = arith.constant 0 : index
    %0 = vector.load %arg1[%c0, %c0_0] : memref<8x128xf32, #tpu.memory_space<vmem>>, vector<8x128xf32>
    %c0_1 = arith.constant 0 : index
    %c0_2 = arith.constant 0 : index
    %1 = vector.load %arg2[%c0_1, %c0_2] : memref<128x512xf32, #tpu.memory_space<vmem>>, vector<128x512xf32>
    %cst = arith.constant dense<0.000000e+00> : vector<8x512xf32>
    %2 = tpu.matmul %0, %1, %cst {dimension_numbers = #tpu.dot_dimension_numbers<[1], [0], [0], [1], [0, 0, 1, 1], [], []>} : vector<8x128xf32>, vector<128x512xf32>, vector<8x512xf32> -> vector<8x512xf32>
    %c0_3 = arith.constant 0 : index
    %c0_4 = arith.constant 0 : index
    %3 = vector.load %arg3[%c0_3, %c0_4] : memref<1x512xf32, #tpu.memory_space<vmem>>, vector<1x512xf32>
    %4 = vector.broadcast %3 : vector<1x512xf32> to vector<8x512xf32>
    %5 = arith.addf %2, %4 : vector<8x512xf32>
    %cst_5 = arith.constant 0.000000e+00 : f32
    %6 = vector.broadcast %cst_5 : f32 to vector<8x512xf32>
    %7 = arith.maximumf %5, %6 : vector<8x512xf32>
    %c0_6 = arith.constant 0 : index
    %c0_7 = arith.constant 0 : index
    %8 = vector.load %arg4[%c0_6, %c0_7] : memref<512x128xf32, #tpu.memory_space<vmem>>, vector<512x128xf32>
    %cst_8 = arith.constant dense<0.000000e+00> : vector<8x128xf32>
    %9 = tpu.matmul %7, %8, %cst_8 {dimension_numbers = #tpu.dot_dimension_numbers<[1], [0], [0], [1], [0, 0, 1, 1], [], []>} : vector<8x512xf32>, vector<512x128xf32>, vector<8x128xf32> -> vector<8x128xf32>
    %c0_9 = arith.constant 0 : index
    %c0_10 = arith.constant 0 : index
    %10 = vector.load %arg5[%c0_9, %c0_10] : memref<1x128xf32, #tpu.memory_space<vmem>>, vector<1x128xf32>
    %11 = vector.broadcast %10 : vector<1x128xf32> to vector<8x128xf32>
    %12 = arith.addf %9, %11 : vector<8x128xf32>
    %13 = arith.negf %12 : vector<8x128xf32>
    %14 = math.exp %13 : vector<8x128xf32>
    %cst_11 = arith.constant 1.000000e+00 : f32
    %15 = vector.broadcast %cst_11 : f32 to vector<8x128xf32>
    %16 = arith.addf %15, %14 : vector<8x128xf32>
    %17 = arith.divf %15, %16 : vector<8x128xf32>
    %c0_12 = arith.constant 0 : index
    %c0_13 = arith.constant 0 : index
    %18 = vector.load %arg6[%c0_12, %c0_13] : memref<8x128xf32, #tpu.memory_space<vmem>>, vector<8x128xf32>
    tpu.vector_store %arg6[%c0_12, %c0_13], %17 {strides = array<i32>} : memref<8x128xf32, #tpu.memory_space<vmem>>, vector<8x128xf32>,
    return
  }
  func.func @transform_0(%arg0: i32) -> (i32, i32) {
    %c0_i32 = arith.constant 0 : i32
    %c0_i32_0 = arith.constant 0 : i32
    return %arg0, %c0_i32 : i32, i32
  }
  func.func @transform_1(%arg0: i32) -> (i32, i32) {
    %c0_i32 = arith.constant 0 : i32
    %c0_i32_0 = arith.constant 0 : i32
    %c0_i32_1 = arith.constant 0 : i32
    return %c0_i32, %c0_i32_0 : i32, i32
  }
  func.func @transform_2(%arg0: i32) -> (i32, i32) {
    %c0_i32 = arith.constant 0 : i32
    %c0_i32_0 = arith.constant 0 : i32
    %c0_i32_1 = arith.constant 0 : i32
    return %c0_i32, %c0_i32_0 : i32, i32
  }
  func.func @transform_3(%arg0: i32) -> (i32, i32) {
    %c0_i32 = arith.constant 0 : i32
    %c0_i32_0 = arith.constant 0 : i32
    %c0_i32_1 = arith.constant 0 : i32
    return %c0_i32, %c0_i32_0 : i32, i32
  }
  func.func @transform_4(%arg0: i32) -> (i32, i32) {
    %c0_i32 = arith.constant 0 : i32
    %c0_i32_0 = arith.constant 0 : i32
    %c0_i32_1 = arith.constant 0 : i32
    return %c0_i32, %c0_i32_0 : i32, i32
  }
  func.func @transform_5(%arg0: i32) -> (i32, i32) {
    %c0_i32 = arith.constant 0 : i32
    %c0_i32_0 = arith.constant 0 : i32
    return %arg0, %c0_i32 : i32, i32
  }
}

</mosaic_0001>

<bundles_post_ra>
// kernel: cfr_classifier_forward.1
= control target key start
LH: loop header
LB: loop body
LE: loop exit
PB: predicated region body
PF: predicated region fallthrough
CT: control target
= control target key end

     0   :  { %v552_v3 = vmov 0.0   ;;  %s979_s1 = inlined_call_operand.vmem [shape: f32[128,512], index: 1, kind: input, shape index: {}]   ;;  %s980_s0 = inlined_call_operand.vmem [shape: f32[8,128], index: 0, kind: input, shape index: {}]   ;;  %s981_s3 = inlined_call_operand.vmem [shape: f32[512,128], index: 3, kind: input, shape index: {}]   ;;  %s982_s2 = inlined_call_operand.vmem [shape: f32[1,512], index: 2, kind: input, shape index: {}]   ;;  %s983_s4 = inlined_call_operand.vmem [shape: f32[1,128], index: 4, kind: input, shape index: {}]   ;;  %s984_s5 = inlined_call_operand.vmem [shape: f32[8,128], index: 5, kind: output, shape index: {}]  }
   0x1   :  { %v82_v0 = vld [vmem:[%s979_s1 + $0x1e8] sm:$0xff]  ;;  %v84_v1 = vld [vmem:[%s979_s1 + $0x1f8] sm:$0xff]  ;;  %v81_v2 = vld [vmem:[%s979_s1 + $0x1e0] sm:$0xff]  ;;  %171 = vmatprep.mubr.f32.mxu0 %v552_v3  ;;  %242 = vmatprep.mubr.f32.mxu1 %v552_v3 }
   0x2   :  { %107 = vmatprep.subr.mxu0 %v82_v0  ;;  %178 = vmatprep.subr.mxu1 %v84_v1  ;;  %v83_v4 = vld [vmem:[%s979_s1 + $0x1f0] sm:$0xff]  ;;  %v78_v5 = vld [vmem:[%s979_s1 + $0x1c8] sm:$0xff]  ;;  %v80_v6 = vld [vmem:[%s979_s1 + $0x1d8] sm:$0xff] }
   0x3   :  { %108 = vmatpush1.msra.mxu0 %v81_v2  ;;  %179 = vmatpush1.msra.mxu1 %v83_v4  ;;  %v77_v7 = vld [vmem:[%s979_s1 + $0x1c0] sm:$0xff]  ;;  %v79_v8 = vld [vmem:[%s979_s1 + $0x1d0] sm:$0xff]  ;;  %v74_v9 = vld [vmem:[%s979_s1 + $0x1a8] sm:$0xff] }
   0x4   :  { %109 = vmatprep.subr.mxu0 %v78_v5  ;;  %180 = vmatprep.subr.mxu1 %v80_v6  ;;  %v76_v10 = vld [vmem:[%s979_s1 + $0x1b8] sm:$0xff]  ;;  %v73_v11 = vld [vmem:[%s979_s1 + $0x1a0] sm:$0xff]  ;;  %v75_v12 = vld [vmem:[%s979_s1 + $0x1b0] sm:$0xff] }
   0x5   :  { %110 = vmatpush1.msra.mxu0 %v77_v7  ;;  %181 = vmatpush1.msra.mxu1 %v79_v8  ;;  %v70_v13 = vld [vmem:[%s979_s1 + $0x188] sm:$0xff]  ;;  %v72_v14 = vld [vmem:[%s979_s1 + $0x198] sm:$0xff]  ;;  %v69_v15 = vld [vmem:[%s979_s1 + $0x180] sm:$0xff] }
   0x6   :  { %111 = vmatprep.subr.mxu0 %v74_v9  ;;  %182 = vmatprep.subr.mxu1 %v76_v10  ;;  %v71_v16 = vld [vmem:[%s979_s1 + $0x190] sm:$0xff]  ;;  %v66_v17 = vld [vmem:[%s979_s1 + $0x168] sm:$0xff]  ;;  %v68_v18 = vld [vmem:[%s979_s1 + $0x178] sm:$0xff] }
   0x7   :  { %112 = vmatpush1.msra.mxu0 %v73_v11  ;;  %183 = vmatpush1.msra.mxu1 %v75_v12  ;;  %v65_v19 = vld [vmem:[%s979_s1 + $0x160] sm:$0xff]  ;;  %v67_v20 = vld [vmem:[%s979_s1 + $0x170] sm:$0xff]  ;;  %v62_v21 = vld [vmem:[%s979_s1 + $0x148] sm:$0xff] }
   0x8   :  { %113 = vmatprep.subr.mxu0 %v70_v13  ;;  %184 = vmatprep.subr.mxu1 %v72_v14  ;;  %v64_v22 = vld [vmem:[%s979_s1 + $0x158] sm:$0xff]  ;;  %v61_v23 = vld [vmem:[%s979_s1 + $0x140] sm:$0xff]  ;;  %v63_v24 = vld [vmem:[%s979_s1 + $0x150] sm:$0xff] }
   0x9   :  { %114 = vmatpush1.msra.mxu0 %v69_v15  ;;  %185 = vmatpush1.msra.mxu1 %v71_v16  ;;  %v58_v25 = vld [vmem:[%s979_s1 + $0x128] sm:$0xff]  ;;  %v60_v26 = vld [vmem:[%s979_s1 + $0x138] sm:$0xff]  ;;  %v57_v27 = vld [vmem:[%s979_s1 + $0x120] sm:$0xff] }
   0xa   :  { %115 = vmatprep.subr.mxu0 %v66_v17  ;;  %186 = vmatprep.subr.mxu1 %v68_v18  ;;  %v59_v28 = vld [vmem:[%s979_s1 + $0x130] sm:$0xff]  ;;  %v54_v29 = vld [vmem:[%s979_s1 + $0x108] sm:$0xff]  ;;  %v56_v30 = vld [vmem:[%s979_s1 + $0x118] sm:$0xff] }
   0xb   :  { %116 = vmatpush1.msra.mxu0 %v65_v19  ;;  %187 = vmatpush1.msra.mxu1 %v67_v20  ;;  %v53_v31 = vld [vmem:[%s979_s1 + $0x100] sm:$0xff]  ;;  %v55_v32 = vld [vmem:[%s979_s1 + $0x110] sm:$0xff]  ;;  %v50_v33 = vld [vmem:[%s979_s1 + $0xe8] sm:$0xff] }
   0xc   :  { %117 = vmatprep.subr.mxu0 %v62_v21  ;;  %188 = vmatprep.subr.mxu1 %v64_v22  ;;  %v52_v34 = vld [vmem:[%s979_s1 + $0xf8] sm:$0xff]  ;;  %v49_v35 = vld [vmem:[%s979_s1 + $0xe0] sm:$0xff]  ;;  %v51_v36 = vld [vmem:[%s979_s1 + $0xf0] sm:$0xff] }
   0xd   :  { %118 = vmatpush1.msra.mxu0 %v61_v23  ;;  %189 = vmatpush1.msra.mxu1 %v63_v24  ;;  %v46_v37 = vld [vmem:[%s979_s1 + $0xc8] sm:$0xff]  ;;  %v48_v38 = vld [vmem:[%s979_s1 + $0xd8] sm:$0xff]  ;;  %v45_v39 = vld [vmem:[%s979_s1 + $0xc0] sm:$0xff] }
   0xe   :  { %119 = vmatprep.subr.mxu0 %v58_v25  ;;  %190 = vmatprep.subr.mxu1 %v60_v26  ;;  %v47_v40 = vld [vmem:[%s979_s1 + $0xd0] sm:$0xff]  ;;  %v42_v41 = vld [vmem:[%s979_s1 + $0xa8] sm:$0xff]  ;;  %v44_v42 = vld [vmem:[%s979_s1 + $0xb8] sm:$0xff] }
   0xf   :  { %120 = vmatpush1.msra.mxu0 %v57_v27  ;;  %191 = vmatpush1.msra.mxu1 %v59_v28  ;;  %v41_v43 = vld [vmem:[%s979_s1 + $0xa0] sm:$0xff]  ;;  %v43_v44 = vld [vmem:[%s979_s1 + $0xb0] sm:$0xff]  ;;  %v38_v45 = vld [vmem:[%s979_s1 + $0x88] sm:$0xff] }
  0x10   :  { %121 = vmatprep.subr.mxu0 %v54_v29  ;;  %192 = vmatprep.subr.mxu1 %v56_v30  ;;  %v40_v46 = vld [vmem:[%s979_s1 + $0x98] sm:$0xff]  ;;  %v37_v47 = vld [vmem:[%s979_s1 + $0x80] sm:$0xff]  ;;  %v39_v48 = vld [vmem:[%s979_s1 + $0x90] sm:$0xff] }
  0x11   :  { %122 = vmatpush1.msra.mxu0 %v53_v31  ;;  %193 = vmatpush1.msra.mxu1 %v55_v32  ;;  %v34_v49 = vld [vmem:[%s979_s1 + $0x68] sm:$0xff]  ;;  %v36_v50 = vld [vmem:[%s979_s1 + $0x78] sm:$0xff]  ;;  %v33_v51 = vld [vmem:[%s979_s1 + $0x60] sm:$0xff] }
  0x12   :  { %123 = vmatprep.subr.mxu0 %v50_v33  ;;  %194 = vmatprep.subr.mxu1 %v52_v34  ;;  %v35_v52 = vld [vmem:[%s979_s1 + $0x70] sm:$0xff]  ;;  %v30_v53 = vld [vmem:[%s979_s1 + $0x48] sm:$0xff]  ;;  %v32_v54 = vld [vmem:[%s979_s1 + $0x58] sm:$0xff] }
  0x13   :  { %124 = vmatpush1.msra.mxu0 %v49_v35  ;;  %195 = vmatpush1.msra.mxu1 %v51_v36  ;;  %v29_v55 = vld [vmem:[%s979_s1 + $0x40] sm:$0xff]  ;;  %v31_v56 = vld [vmem:[%s979_s1 + $0x50] sm:$0xff]  ;;  %v26_v57 = vld [vmem:[%s979_s1 + $0x28] sm:$0xff] }
  0x14   :  { %125 = vmatprep.subr.mxu0 %v46_v37  ;;  %196 = vmatprep.subr.mxu1 %v48_v38  ;;  %v28_v58 = vld [vmem:[%s979_s1 + $0x38] sm:$0xff]  ;;  %v25_v59 = vld [vmem:[%s979_s1 + $0x20] sm:$0xff]  ;;  %v27_v60 = vld [vmem:[%s979_s1 + $0x30] sm:$0xff] }
  0x15   :  { %126 = vmatpush1.msra.mxu0 %v45_v39  ;;  %197 = vmatpush1.msra.mxu1 %v47_v40  ;;  %v22_v61 = vld [vmem:[%s979_s1 + $0x8] sm:$0xff]  ;;  %v24_v62 = vld [vmem:[%s979_s1 + $0x18] sm:$0xff]  ;;  %v21_v63 = vld [vmem:[%s979_s1] sm:$0xff] }
  0x16   :  { %127 = vmatprep.subr.mxu0 %v42_v41  ;;  %198 = vmatprep.subr.mxu1 %v44_v42  ;;  %v23_v0 = vld [vmem:[%s979_s1 + $0x10] sm:$0xff]  ;;  %v20_v1 = vld [vmem:[%s980_s0] sm:$0xff]  ;;  %v284_v2 = vld [vmem:[%s981_s3 + $0xf8] sm:$0xff] }
  0x17   :  { %128 = vmatpush1.msra.mxu0 %v41_v43  ;;  %199 = vmatpush1.msra.mxu1 %v43_v44  ;;  %v316_v3 = vld [vmem:[%s981_s3 + $0x1f8] sm:$0xff]  ;;  %v283_v6 = vld [vmem:[%s981_s3 + $0xf0] sm:$0xff]  ;;  %v282_v10 = vld [vmem:[%s981_s3 + $0xe8] sm:$0xff] }
  0x18   :  { %129 = vmatprep.subr.mxu0 %v38_v45  ;;  %200 = vmatprep.subr.mxu1 %v40_v46  ;;  %v268_v4 = vld [vmem:[%s981_s3 + $0x78] sm:$0xff]  ;;  %v315_v7 = vld [vmem:[%s981_s3 + $0x1f0] sm:$0xff]  ;;  %v314_v11 = vld [vmem:[%s981_s3 + $0x1e8] sm:$0xff] }
  0x19   :  { %130 = vmatpush1.msra.mxu0 %v37_v47  ;;  %201 = vmatpush1.msra.mxu1 %v39_v48  ;;  %v300_v5 = vld [vmem:[%s981_s3 + $0x178] sm:$0xff]  ;;  %v267_v8 = vld [vmem:[%s981_s3 + $0x70] sm:$0xff]  ;;  %v266_v12 = vld [vmem:[%s981_s3 + $0x68] sm:$0xff] }
  0x1a   :  { %131 = vmatprep.subr.mxu0 %v34_v49  ;;  %202 = vmatprep.subr.mxu1 %v36_v50  ;;  %v299_v9 = vld [vmem:[%s981_s3 + $0x170] sm:$0xff]  ;;  %v298_v13 = vld [vmem:[%s981_s3 + $0x168] sm:$0xff]  ;;  %v281_v14 = vld [vmem:[%s981_s3 + $0xe0] sm:$0xff] }
  0x1b   :  { %132 = vmatpush1.msra.mxu0 %v33_v51  ;;  %203 = vmatpush1.msra.mxu1 %v35_v52  ;;  %v313_v15 = vld [vmem:[%s981_s3 + $0x1e0] sm:$0xff]  ;;  %v280_v18 = vld [vmem:[%s981_s3 + $0xd8] sm:$0xff]  ;;  %v279_v22 = vld [vmem:[%s981_s3 + $0xd0] sm:$0xff] }
  0x1c   :  { %133 = vmatprep.subr.mxu0 %v30_v53  ;;  %204 = vmatprep.subr.mxu1 %v32_v54  ;;  %v265_v16 = vld [vmem:[%s981_s3 + $0x60] sm:$0xff]  ;;  %v312_v19 = vld [vmem:[%s981_s3 + $0x1d8] sm:$0xff]  ;;  %v311_v23 = vld [vmem:[%s981_s3 + $0x1d0] sm:$0xff] }
  0x1d   :  { %134 = vmatpush1.msra.mxu0 %v29_v55  ;;  %205 = vmatpush1.msra.mxu1 %v31_v56  ;;  %v297_v17 = vld [vmem:[%s981_s3 + $0x160] sm:$0xff]  ;;  %v264_v20 = vld [vmem:[%s981_s3 + $0x58] sm:$0xff]  ;;  %v263_v24 = vld [vmem:[%s981_s3 + $0x50] sm:$0xff] }
  0x1e   :  { %135 = vmatprep.subr.mxu0 %v26_v57  ;;  %206 = vmatprep.subr.mxu1 %v28_v58  ;;  %v296_v21 = vld [vmem:[%s981_s3 + $0x158] sm:$0xff]  ;;  %v295_v25 = vld [vmem:[%s981_s3 + $0x150] sm:$0xff]  ;;  %v278_v26 = vld [vmem:[%s981_s3 + $0xc8] sm:$0xff] }
  0x1f   :  { %136 = vmatpush1.msra.mxu0 %v25_v59  ;;  %207 = vmatpush1.msra.mxu1 %v27_v60  ;;  %v310_v27 = vld [vmem:[%s981_s3 + $0x1c8] sm:$0xff]  ;;  %v277_v30 = vld [vmem:[%s981_s3 + $0xc0] sm:$0xff]  ;;  %v276_v34 = vld [vmem:[%s981_s3 + $0xb8] sm:$0xff] }
  0x20   :  { %137 = vmatprep.subr.mxu0 %v22_v61  ;;  %208 = vmatprep.subr.mxu1 %v24_v62  ;;  %v262_v28 = vld [vmem:[%s981_s3 + $0x48] sm:$0xff]  ;;  %v309_v31 = vld [vmem:[%s981_s3 + $0x1c0] sm:$0xff]  ;;  %v308_v35 = vld [vmem:[%s981_s3 + $0x1b8] sm:$0xff] }
  0x21   :  { %138 = vmatpush1.msra.mxu0 %v21_v63  ;;  %209 = vmatpush1.msra.mxu1 %v23_v0  ;;  %v294_v29 = vld [vmem:[%s981_s3 + $0x148] sm:$0xff]  ;;  %v261_v32 = vld [vmem:[%s981_s3 + $0x40] sm:$0xff]  ;;  %v260_v36 = vld [vmem:[%s981_s3 + $0x38] sm:$0xff] }
  0x22   :  { %172 = vmatmul.mubr.f32.vlgmr.msra.gmra.mxu0 %v20_v1  ;;  %243 = vmatmul.mubr.f32.vlgmr.msra.gmra.mxu1 %v20_v1  ;;  %v293_v33 = vld [vmem:[%s981_s3 + $0x140] sm:$0xff]  ;;  %v292_v37 = vld [vmem:[%s981_s3 + $0x138] sm:$0xff]  ;;  %v275_v38 = vld [vmem:[%s981_s3 + $0xb0] sm:$0xff] }
  0x23   :  { %477 = vmatprep.subr.mxu0 %v284_v2  ;;  %512 = vmatprep.subr.mxu1 %v316_v3  ;;  %v307_v39 = vld [vmem:[%s981_s3 + $0x1b0] sm:$0xff]  ;;  %v274_v42 = vld [vmem:[%s981_s3 + $0xa8] sm:$0xff]  ;;  %v273_v46 = vld [vmem:[%s981_s3 + $0xa0] sm:$0xff]  ;;  %v87_v2 = vlaneseq }
  0x24   :  { %478 = vmatpush3.msra.mxu0 %v268_v4  ;;  %513 = vmatpush3.msra.mxu1 %v300_v5  ;;  %v259_v40 = vld [vmem:[%s981_s3 + $0x30] sm:$0xff]  ;;  %v306_v43 = vld [vmem:[%s981_s3 + $0x1a8] sm:$0xff]  ;;  %v305_v47 = vld [vmem:[%s981_s3 + $0x1a0] sm:$0xff] }
  0x25   :  { %479 = vmatprep.subr.mxu0 %v283_v6  ;;  %514 = vmatprep.subr.mxu1 %v315_v7  ;;  %v291_v41 = vld [vmem:[%s981_s3 + $0x130] sm:$0xff]  ;;  %v258_v44 = vld [vmem:[%s981_s3 + $0x28] sm:$0xff]  ;;  %v257_v48 = vld [vmem:[%s981_s3 + $0x20] sm:$0xff]  ;;  %v88_v3 = vshrl.u32 %v87_v2, 7 }
  0x26   :  { %480 = vmatpush3.msra.mxu0 %v267_v8  ;;  %515 = vmatpush3.msra.mxu1 %v299_v9  ;;  %v290_v45 = vld [vmem:[%s981_s3 + $0x128] sm:$0xff]  ;;  %v289_v49 = vld [vmem:[%s981_s3 + $0x120] sm:$0xff]  ;;  %v272_v50 = vld [vmem:[%s981_s3 + $0x98] sm:$0xff] }
  0x27   :  { %481 = vmatprep.subr.mxu0 %v282_v10  ;;  %516 = vmatprep.subr.mxu1 %v314_v11  ;;  %v304_v51 = vld [vmem:[%s981_s3 + $0x198] sm:$0xff]  ;;  %v271_v54 = vld [vmem:[%s981_s3 + $0x90] sm:$0xff]  ;;  %v270_v58 = vld [vmem:[%s981_s3 + $0x88] sm:$0xff]  ;;  %v97_v4 = vsub.s32 2, %v88_v3  ;;  %v89_v5 = vsub.s32 0, %v88_v3  ;;  %v93_v7 = vsub.s32 1, %v88_v3 }
  0x28   :  { %482 = vmatpush3.msra.mxu0 %v266_v12  ;;  %517 = vmatpush3.msra.mxu1 %v298_v13  ;;  %v256_v52 = vld [vmem:[%s981_s3 + $0x18] sm:$0xff]  ;;  %v303_v55 = vld [vmem:[%s981_s3 + $0x190] sm:$0xff]  ;;  %v302_v59 = vld [vmem:[%s981_s3 + $0x188] sm:$0xff]  ;;  %v101_v8 = vsub.s32 3, %v88_v3 }
  0x29   :  { %483 = vmatprep.subr.mxu0 %v281_v14  ;;  %518 = vmatprep.subr.mxu1 %v313_v15  ;;  %v288_v53 = vld [vmem:[%s981_s3 + $0x118] sm:$0xff]  ;;  %v255_v56 = vld [vmem:[%s981_s3 + $0x10] sm:$0xff]  ;;  %v254_v60 = vld [vmem:[%s981_s3 + $0x8] sm:$0xff] }
  0x2a   :  { %484 = vmatpush3.msra.mxu0 %v265_v16  ;;  %519 = vmatpush3.msra.mxu1 %v297_v17  ;;  %v287_v57 = vld [vmem:[%s981_s3 + $0x110] sm:$0xff]  ;;  %v286_v61 = vld [vmem:[%s981_s3 + $0x108] sm:$0xff]  ;;  %v269_v62 = vld [vmem:[%s981_s3 + $0x80] sm:$0xff] }
  0x2b   :  { %485 = vmatprep.subr.mxu0 %v280_v18  ;;  %520 = vmatprep.subr.mxu1 %v312_v19  ;;  %v301_v63 = vld [vmem:[%s981_s3 + $0x180] sm:$0xff] }
  0x2c   :  { %486 = vmatpush3.msra.mxu0 %v264_v20  ;;  %521 = vmatpush3.msra.mxu1 %v296_v21  ;;  %v253_v0 = vld [vmem:[%s981_s3] sm:$0xff] }
  0x2d   :  { %487 = vmatprep.subr.mxu0 %v279_v22  ;;  %522 = vmatprep.subr.mxu1 %v311_v23  ;;  %v285_v1 = vld [vmem:[%s981_s3 + $0x100] sm:$0xff] }
  0x2e   :  { %488 = vmatpush3.msra.mxu0 %v263_v24  ;;  %523 = vmatpush3.msra.mxu1 %v295_v25  ;;  %v85_v6 = vld [vmem:[%s982_s2] sm:$0xf] }
  0x2f   :  { %489 = vmatprep.subr.mxu0 %v278_v26  ;;  %524 = vmatprep.subr.mxu1 %v310_v27  ;;  %v98_v9 = vrot.slane %v85_v6, %v97_v4  ;;  %v90_v10 = vrot.slane %v85_v6, %v89_v5  ;;  %v94_v11 = vrot.slane %v85_v6, %v93_v7  ;;  %v475_v27 = vld [vmem:[%s983_s4] ss:$0 sm:$0xff] }
  0x30   :  { %490 = vmatpush3.msra.mxu0 %v262_v28  ;;  %525 = vmatpush3.msra.mxu1 %v294_v29  ;;  %v102_v12 = vrot.slane %v85_v6, %v101_v8 }
  0x31   :  { %491 = vmatprep.subr.mxu0 %v277_v30  ;;  %526 = vmatprep.subr.mxu1 %v309_v31 }
  0x32   :  { %492 = vmatpush3.msra.mxu0 %v261_v32  ;;  %527 = vmatpush3.msra.mxu1 %v293_v33 }
  0x33   :  { %493 = vmatprep.subr.mxu0 %v276_v34  ;;  %528 = vmatprep.subr.mxu1 %v308_v35 }
  0x34   :  { %494 = vmatpush3.msra.mxu0 %v260_v36  ;;  %529 = vmatpush3.msra.mxu1 %v292_v37 }
  0x35   :  { %495 = vmatprep.subr.mxu0 %v275_v38  ;;  %530 = vmatprep.subr.mxu1 %v307_v39 }
  0x36   :  { %496 = vmatpush3.msra.mxu0 %v259_v40  ;;  %531 = vmatpush3.msra.mxu1 %v291_v41 }
  0x37   :  { %497 = vmatprep.subr.mxu0 %v274_v42  ;;  %532 = vmatprep.subr.mxu1 %v306_v43 }
  0x38   :  { %498 = vmatpush3.msra.mxu0 %v258_v44  ;;  %533 = vmatpush3.msra.mxu1 %v290_v45 }
  0x39   :  { %499 = vmatprep.subr.mxu0 %v273_v46  ;;  %534 = vmatprep.subr.mxu1 %v305_v47 }
  0x3a   :  { %500 = vmatpush3.msra.mxu0 %v257_v48  ;;  %535 = vmatpush3.msra.mxu1 %v289_v49 }
  0x3b   :  { %501 = vmatprep.subr.mxu0 %v272_v50  ;;  %536 = vmatprep.subr.mxu1 %v304_v51 }
  0x3c   :  { %502 = vmatpush3.msra.mxu0 %v256_v52  ;;  %537 = vmatpush3.msra.mxu1 %v288_v53 }
  0x3d   :  { %503 = vmatprep.subr.mxu0 %v271_v54  ;;  %538 = vmatprep.subr.mxu1 %v303_v55 }
  0x3e   :  { %504 = vmatpush3.msra.mxu0 %v255_v56  ;;  %539 = vmatpush3.msra.mxu1 %v287_v57 }
  0x3f   :  { %505 = vmatprep.subr.mxu0 %v270_v58  ;;  %540 = vmatprep.subr.mxu1 %v302_v59 }
  0x40   :  { %506 = vmatpush3.msra.mxu0 %v254_v60  ;;  %541 = vmatpush3.msra.mxu1 %v286_v61 }
  0x41   :  { %507 = vmatprep.subr.mxu0 %v269_v62  ;;  %542 = vmatprep.subr.mxu1 %v301_v63 }
  0x42   :  { %508 = vmatpush3.msra.mxu0 %v253_v0  ;;  %543 = vmatpush3.msra.mxu1 %v285_v1 }
  0xe2   :  { %v173_v13 = vpop.f32.mrf.mxu0  ;;  %v244_v14 = vpop.f32.mrf.mxu1 }
  0xe3   :  { %v245_v15 = vadd.f32 %v244_v14, %v98_v9  ;;  %v174_v16 = vadd.f32 %v173_v13, %v90_v10 }
  0xe4   :  { %v175_v17 = vpop.f32.mrf.mxu0  ;;  %v246_v18 = vpop.f32.mrf.mxu1 }
  0xe5   :  { %v176_v19 = vadd.f32 %v175_v17, %v94_v11  ;;  %v247_v20 = vadd.f32 %v246_v18, %v102_v12  ;;  %v251_v21 = vmax.f32 %v245_v15, 0.0  ;;  %v249_v24 = vmax.f32 %v174_v16, 0.0 }
  0xe7   :  { %v250_v22 = vmax.f32 %v176_v19, 0.0  ;;  %v252_v23 = vmax.f32 %v247_v20, 0.0 }
  0xe9   :  { %388 = vmatprep.mubr.f32.mxu0 %v250_v22  ;;  %458 = vmatprep.mubr.f32.mxu1 %v252_v23 }
  0xea   :  { %389 = vmatmul.mubr.f32.vlgmr.msra.gmra.mxu0 %v249_v24  ;;  %459 = vmatmul.mubr.f32.vlgmr.msra.gmra.mxu1 %v251_v21 }
 0x1aa   :  { %v509_v25 = vpop.f32.mrf.mxu0  ;;  %v544_v26 = vpop.f32.mrf.mxu1 }
 0x1ac   :  { %v510_v28 = vpop.f32.mrf.mxu0  ;;  %v545_v29 = vpop.f32.mrf.mxu1 }
 0x1ad   :  { %v511_v30 = vadd.f32 %v510_v28, %v509_v25  ;;  %v546_v32 = vadd.f32 %v545_v29, %v544_v26 }
 0x1af   :  { %v391_v31 = vadd.f32 %v511_v30, %v475_v27 }
 0x1b1   :  { %v461_v33 = vadd.f32 %v546_v32, %v391_v31 }
 0x1b3   :  { %v476_v34 = vmul.f32 -1.442695, %v461_v33 }
 0x1b5   :  { %548 = vpow2.f32 %v476_v34 }
 0x1c2   :  { %v549_v35 = vpop.eup %548 }
 0x1c3   :  { %v467_v36 = vadd.f32 1.0, %v549_v35 }
 0x1c5   :  { %550 = vrcp.f32 %v467_v36 }
 0x1d2   :  { %v551_v37 = vpop.eup %550 }
 0x1d3   :  { %470 = vst [vmem:[%s984_s5] sm:$0xff] %v551_v37 }

</bundles_post_ra>
